<compile_context>
chip_gen: v7x
topology: tpu7x:2x2x1
jax: 0.10.0
libtpu: 0.0.40
codegen_flags: <defaults>
</compile_context>

<pallas_src>
import functools
import math

import jax
import jax.numpy as jnp
from jax import lax
from jax.experimental import pallas as pl
from jax.experimental.pallas import tpu as pltpu

HIDDEN = 100        # logical hidden width of the PyTorch module
H_PAD = 128         # hidden padded to one full MXU / lane tile
MAX_BLOCK_B = 2048  # batch rows per grid step (sweep 1024-4096 per chip)


def _round_up(x, m):
    return ((x + m - 1) // m) * m


def actor_critic_kernel(xin_ref, p_ref, out_ref, *, in_w, a_dim, out_w):
    H = H_PAD
    A = a_dim
    W = out_w

    # static row offsets into the packed parameter slab (all multiples of 8)
    w1_off = 0
    w2_off = in_w
    wh_off = in_w + H
    b_off = in_w + 2 * H

    xin = xin_ref[...]                               # (bb, in_w) = [noise | x]

    w1 = p_ref[w1_off:w1_off + in_w, :]              # (in_w, 128); noise rows 0
    w2 = p_ref[w2_off:w2_off + H, :]                 # (128, 128)
    wh = p_ref[wh_off:wh_off + H, :]                 # (128, 128) actor|critic
    bias = p_ref[b_off:b_off + 8, :]                 # (8, 128)

    b1 = bias[0:1, :]
    b2 = bias[1:2, :]
    bh = bias[2:3, :]                                # [ba | bc | 0...]
    soft_std = bias[3:4, :]                          # softplus(std) precomputed

    # fc1 + relu, fc2 + relu  (one 128-wide MXU tile each; padded lanes stay 0)
    h1 = jnp.maximum(
        jnp.dot(xin, w1, preferred_element_type=jnp.float32) + b1, 0.0)
    h2 = jnp.maximum(
        jnp.dot(h1, w2, preferred_element_type=jnp.float32) + b2, 0.0)

    # fused actor/critic head: cols [0:A] actor logits, col A value
    head = jnp.dot(h2, wh, preferred_element_type=jnp.float32) + bh  # (bb,128)

    # build the [action | value | 0] strip fully in registers, one store.
    sub = head[:, 0:W]                               # [logits(A) | value | 0]
    # action path valid on lanes < A: noise/std lanes >= A are zero-padded.
    act_path = jnp.tanh(sub) + soft_std[:, 0:W] * xin[:, 0:W]
    lane = lax.broadcasted_iota(jnp.int32, sub.shape, 1)
    out_ref[...] = jnp.where(lane < A, act_path, sub)


def reacher_actor_critic(x, noise, packed, std, *, state_size, action_dim):
    """Fused forward pass. Returns (action, log_prob, entropy, value)."""
    A = action_dim
    B = x.shape[0]
    s_pad = _round_up(max(state_size, 8), 8)
    noise_w = _round_up(A, 8)
    out_w = _round_up(A + 1, 8)
    in_w = noise_w + s_pad

    x = x.astype(jnp.float32)
    noise = noise.astype(jnp.float32)

    # batch blocking: big blocks to amortize the ~0.35us/step overhead, but
    # always >=2 grid steps once B > 8 so v7x can shard the parallel axis.
    if B <= 8:
        block_b = 8
    else:
        block_b = min(MAX_BLOCK_B, _round_up(pl.cdiv(B, 2), 8))
    b_pad = _round_up(B, block_b)

    # one fused [noise | x] input slab -> a single input DMA stream per step
    noise_p = jnp.pad(noise, ((0, b_pad - B), (0, noise_w - A)))
    x_p = jnp.pad(x, ((0, b_pad - B), (0, s_pad - state_size)))
    xin = jnp.concatenate([noise_p, x_p], axis=1)    # (b_pad, in_w)

    grid = (b_pad // block_b,)
    kernel = functools.partial(actor_critic_kernel,
                               in_w=in_w, a_dim=A, out_w=out_w)

    out = pl.pallas_call(
        kernel,
        out_shape=jax.ShapeDtypeStruct((b_pad, out_w), jnp.float32),
        grid=grid,
        in_specs=[
            pl.BlockSpec((block_b, in_w), lambda i: (i, 0)),           # [noise|x]
            pl.BlockSpec((packed.shape[0], H_PAD), lambda i: (0, 0)),  # params
        ],
        out_specs=pl.BlockSpec((block_b, out_w), lambda i: (i, 0)),
        compiler_params=pltpu.CompilerParams(
            dimension_semantics=("parallel",),
            # explicit scoped-VMEM limit; safe on v5e (16MiB default) and
            # well under v7x's 64MiB physical.
            vmem_limit_bytes=32 * 1024 * 1024),
    )(xin, packed)

    out = out[:B]
    action = out[:, 0:A]
    value = out[:, A:A + 1]

    # log_prob / entropy never touch the network: pure functions of noise/std.
    # Computed here in the wrapper (XLA fuses this trivially).
    soft_std = jax.nn.softplus(std.astype(jnp.float32))      # (1, A)
    log_std = jnp.log(soft_std)
    half_log_2pi = 0.5 * math.log(2.0 * math.pi)
    # (action - mean) / std == noise for the reparameterized sample
    log_prob = -0.5 * noise * noise - log_std - half_log_2pi
    entropy = jnp.broadcast_to(0.5 + half_log_2pi + log_std, (B, A))
    return action, log_prob, entropy, value


def init_params(key, state_size, action_dim, hidden=HIDDEN):
    """PyTorch-Linear-style init (uniform +/- 1/sqrt(fan_in)); weights stored
    as (in, out), i.e. transposed vs nn.Linear, semantics identical."""
    def linear(k, fan_in, fan_out):
        kw, kb = jax.random.split(k)
        bound = 1.0 / math.sqrt(fan_in)
        w = jax.random.uniform(kw, (fan_in, fan_out), jnp.float32, -bound, bound)
        b = jax.random.uniform(kb, (1, fan_out), jnp.float32, -bound, bound)
        return w, b

    k1, k2, k3, k4 = jax.random.split(key, 4)
    w1, b1 = linear(k1, state_size, hidden)
    w2, b2 = linear(k2, hidden, hidden)
    wa, ba = linear(k3, hidden, action_dim)
    wc, bc = linear(k4, hidden, 1)
    std = jnp.zeros((1, action_dim), jnp.float32)  # nn.Parameter(torch.zeros(1, A))
    return {"w1": w1, "b1": b1, "w2": w2, "b2": b2,
            "wa": wa, "ba": ba, "wc": wc, "bc": bc, "std": std}


def pack_params(params, state_size, action_dim):
    """Pack all parameters into one 128-lane f32 slab (single resident DMA).
    Layout rows: [w1_ext (noise rows zeroed) | w2 | fused head | bias block]."""
    s_pad = _round_up(max(state_size, 8), 8)
    noise_w = _round_up(action_dim, 8)
    in_w = noise_w + s_pad
    H, A, h = H_PAD, action_dim, HIDDEN

    w1 = (jnp.zeros((in_w, H), jnp.float32)
          .at[noise_w:noise_w + state_size, :h].set(params["w1"]))
    w2 = jnp.zeros((H, H), jnp.float32).at[:h, :h].set(params["w2"])
    wh = (jnp.zeros((H, H), jnp.float32)
          .at[:h, :A].set(params["wa"])
          .at[:h, A:A + 1].set(params["wc"]))
    soft_std = jax.nn.softplus(params["std"].astype(jnp.float32))  # precomputed
    bias = (jnp.zeros((8, H), jnp.float32)
            .at[0, :h].set(params["b1"][0])
            .at[1, :h].set(params["b2"][0])
            .at[2, :A].set(params["ba"][0])
            .at[2, A].set(params["bc"][0, 0])
            .at[3, :A].set(soft_std[0]))
    return jnp.concatenate([w1, w2, wh, bias], axis=0)   # (in_w + 264, 128)


if __name__ == "__main__":
    state_size = 16
    action_dim = 4
    batch = 8

    key = jax.random.PRNGKey(0)
    k_params, k_x, k_noise = jax.random.split(key, 3)

    params = init_params(k_params, state_size, action_dim)
    packed = pack_params(params, state_size, action_dim)

    x = jax.random.normal(k_x, (batch, state_size), jnp.float32)
    # standard-normal noise used for the reparameterized Normal sample
    noise = jax.random.normal(k_noise, (batch, action_dim), jnp.float32)

    action, log_prob, entropy, value = jax.block_until_ready(
        reacher_actor_critic(x, noise, packed, params["std"],
                             state_size=state_size, action_dim=action_dim)
    )

    # pure-JAX reference (unpadded weights) for a correctness check
    def ref(x, noise, p):
        h1 = jax.nn.relu(x @ p["w1"] + p["b1"])
        h2 = jax.nn.relu(h1 @ p["w2"] + p["b2"])
        mean = jnp.tanh(h2 @ p["wa"] + p["ba"])
        std = jax.nn.softplus(p["std"])
        act = mean + std * noise
        lp = (-((act - mean) ** 2) / (2 * std ** 2)
              - jnp.log(std) - 0.5 * jnp.log(2 * jnp.pi))
        en = jnp.broadcast_to(0.5 + 0.5 * jnp.log(2 * jnp.pi) + jnp.log(std),
                              act.shape)
        v = h2 @ p["wc"] + p["bc"]
        return act, lp, en, v

    ra, rlp, ren, rv = ref(x, noise, params)
    assert jnp.allclose(action, ra, atol=1e-4)
    assert jnp.allclose(log_prob, rlp, atol=1e-4)
    assert jnp.allclose(entropy, ren, atol=1e-4)
    assert jnp.allclose(value, rv, atol=1e-4)

    print("KERNEL_OK")
</pallas_src>

<mosaic_0001>
module attributes {stable_mosaic.version = 11 : i64} {
  func.func @actor_critic_kernel(%arg0: i32, %arg1: memref<8x24xf32, #tpu.memory_space<vmem>>, %arg2: memref<288x128xf32, #tpu.memory_space<vmem>>, %arg3: memref<8x8xf32, #tpu.memory_space<vmem>>) attributes {dimension_semantics = [#tpu.dimension_semantics<parallel>], iteration_bounds = array<i64: 1>, scalar_prefetch = 0 : i64, scratch_operands = 0 : i64, tpu.core_type = #tpu.core_type<tc>, window_params = [{transform_indices = @transform_0, window_bounds = array<i64: 8, 24>}, {pipeline_mode = #tpu.pipeline_mode<synchronous>, transform_indices = @transform_1, window_bounds = array<i64: 288, 128>}, {transform_indices = @transform_2, window_bounds = array<i64: 8, 8>}]} {
    %c0 = arith.constant 0 : index
    %c0_0 = arith.constant 0 : index
    %0 = vector.load %arg1[%c0, %c0_0] : memref<8x24xf32, #tpu.memory_space<vmem>>, vector<8x24xf32>
    %c0_1 = arith.constant 0 : index
    %c0_2 = arith.constant 0 : index
    %1 = vector.load %arg2[%c0_1, %c0_2] : memref<288x128xf32, #tpu.memory_space<vmem>>, vector<24x128xf32>
    %c24 = arith.constant 24 : index
    %c0_3 = arith.constant 0 : index
    %2 = vector.load %arg2[%c24, %c0_3] : memref<288x128xf32, #tpu.memory_space<vmem>>, vector<128x128xf32>
    %c152 = arith.constant 152 : index
    %c0_4 = arith.constant 0 : index
    %3 = vector.load %arg2[%c152, %c0_4] : memref<288x128xf32, #tpu.memory_space<vmem>>, vector<128x128xf32>
    %c280 = arith.constant 280 : index
    %c0_5 = arith.constant 0 : index
    %4 = vector.load %arg2[%c280, %c0_5] : memref<288x128xf32, #tpu.memory_space<vmem>>, vector<8x128xf32>
    %5 = vector.extract_strided_slice %4 {offsets = [0, 0], sizes = [1, 128], strides = [1, 1]} : vector<8x128xf32> to vector<1x128xf32>
    %6 = vector.extract_strided_slice %4 {offsets = [1, 0], sizes = [1, 128], strides = [1, 1]} : vector<8x128xf32> to vector<1x128xf32>
    %7 = vector.extract_strided_slice %4 {offsets = [2, 0], sizes = [1, 128], strides = [1, 1]} : vector<8x128xf32> to vector<1x128xf32>
    %8 = vector.extract_strided_slice %4 {offsets = [3, 0], sizes = [1, 128], strides = [1, 1]} : vector<8x128xf32> to vector<1x128xf32>
    %cst = arith.constant dense<0.000000e+00> : vector<8x128xf32>
    %9 = tpu.matmul %0, %1, %cst {dimension_numbers = #tpu.dot_dimension_numbers<[1], [0], [0], [1], [0, 0, 1, 1], [], []>} : vector<8x24xf32>, vector<24x128xf32>, vector<8x128xf32> -> vector<8x128xf32>
    %10 = vector.broadcast %5 : vector<1x128xf32> to vector<8x128xf32>
    %11 = arith.addf %9, %10 : vector<8x128xf32>
    %cst_6 = arith.constant 0.000000e+00 : f32
    %12 = vector.broadcast %cst_6 : f32 to vector<8x128xf32>
    %13 = arith.maximumf %11, %12 : vector<8x128xf32>
    %cst_7 = arith.constant dense<0.000000e+00> : vector<8x128xf32>
    %14 = tpu.matmul %13, %2, %cst_7 {dimension_numbers = #tpu.dot_dimension_numbers<[1], [0], [0], [1], [0, 0, 1, 1], [], []>} : vector<8x128xf32>, vector<128x128xf32>, vector<8x128xf32> -> vector<8x128xf32>
    %15 = vector.broadcast %6 : vector<1x128xf32> to vector<8x128xf32>
    %16 = arith.addf %14, %15 : vector<8x128xf32>
    %cst_8 = arith.constant 0.000000e+00 : f32
    %17 = vector.broadcast %cst_8 : f32 to vector<8x128xf32>
    %18 = arith.maximumf %16, %17 : vector<8x128xf32>
    %cst_9 = arith.constant dense<0.000000e+00> : vector<8x128xf32>
    %19 = tpu.matmul %18, %3, %cst_9 {dimension_numbers = #tpu.dot_dimension_numbers<[1], [0], [0], [1], [0, 0, 1, 1], [], []>} : vector<8x128xf32>, vector<128x128xf32>, vector<8x128xf32> -> vector<8x128xf32>
    %20 = vector.broadcast %7 : vector<1x128xf32> to vector<8x128xf32>
    %21 = arith.addf %19, %20 : vector<8x128xf32>
    %22 = vector.extract_strided_slice %21 {offsets = [0, 0], sizes = [8, 8], strides = [1, 1]} : vector<8x128xf32> to vector<8x8xf32>
    %23 = math.tanh %22 : vector<8x8xf32>
    %24 = vector.extract_strided_slice %8 {offsets = [0, 0], sizes = [1, 8], strides = [1, 1]} : vector<1x128xf32> to vector<1x8xf32>
    %25 = vector.extract_strided_slice %0 {offsets = [0, 0], sizes = [8, 8], strides = [1, 1]} : vector<8x24xf32> to vector<8x8xf32>
    %26 = vector.broadcast %24 : vector<1x8xf32> to vector<8x8xf32>
    %27 = arith.mulf %26, %25 : vector<8x8xf32>
    %28 = arith.addf %23, %27 : vector<8x8xf32>
    %29 = tpu.iota {dimensions = array<i32: 1>} : vector<8x8xi32>
    %c4_i32 = arith.constant 4 : i32
    %30 = vector.broadcast %c4_i32 : i32 to vector<8x8xi32>
    %31 = arith.cmpi slt, %29, %30 : vector<8x8xi32>
    %32 = arith.select %31, %28, %22 : vector<8x8xi1>, vector<8x8xf32>
    %c0_10 = arith.constant 0 : index
    %c0_11 = arith.constant 0 : index
    %33 = vector.load %arg3[%c0_10, %c0_11] : memref<8x8xf32, #tpu.memory_space<vmem>>, vector<8x8xf32>
    tpu.vector_store %arg3[%c0_10, %c0_11], %32 {strides = array<i32>} : memref<8x8xf32, #tpu.memory_space<vmem>>, vector<8x8xf32>,
    return
  }
  func.func @transform_0(%arg0: i32) -> (i32, i32) {
    %c0_i32 = arith.constant 0 : i32
    %c0_i32_0 = arith.constant 0 : i32
    return %arg0, %c0_i32 : i32, i32
  }
  func.func @transform_1(%arg0: i32) -> (i32, i32) {
    %c0_i32 = arith.constant 0 : i32
    %c0_i32_0 = arith.constant 0 : i32
    %c0_i32_1 = arith.constant 0 : i32
    return %c0_i32, %c0_i32_0 : i32, i32
  }
  func.func @transform_2(%arg0: i32) -> (i32, i32) {
    %c0_i32 = arith.constant 0 : i32
    %c0_i32_0 = arith.constant 0 : i32
    return %arg0, %c0_i32 : i32, i32
  }
}

</mosaic_0001>

<bundles_post_ra>
// kernel: tpu_custom_call.1
= control target key start
LH: loop header
LB: loop body
LE: loop exit
PB: predicated region body
PF: predicated region fallthrough
CT: control target
= control target key end

     0   :  { %7 = vsyncpa [#allocation3], 0  ;;  %s673_s0 = inlined_call_operand.hbm [shape: f32[8,24], index: 0, kind: input, shape index: {}]   ;;  %s674_s1 = inlined_call_operand.hbm [shape: f32[288,128], index: 1, kind: input, shape index: {}]   ;;  %s675_s2 = inlined_call_operand.hbm [shape: f32[8,8], index: 2, kind: output, shape index: {}]  }
   0x1   :  { %8 = vsyncpa [#allocation6], 0 }
   0x2   :  { %9 = vsyncpa [#allocation4], 0  ;;  %s583_s9 = smov [#allocation2]   ;;  %s584_s11 = smov [#allocation5]  }
   0x3   :  { %s16_s10 = sshll.u32 %s583_s9, 4  ;;  %s25_s12 = sshll.u32 %s584_s11, 4  ;;  %s17_s10 = int_to_ptr.vmem [resolvable:$true] %s16_s10  ;;  %s606_s12 = int_to_ptr.vmem [resolvable:$true] %s25_s12 }
   0x4   :  { %s511_s15 = scalar_lea.hbm %s673_s0, 128 }
   0x5   :  { %p512_p0 = scmp.ne.s32.totalorder %s673_s0, %s511_s15  ;;  %p515_p1 = scmp.lt.u32.totalorder %s511_s15, %s673_s0 }
   0x7   :  { %p517_p2 = pnand %p515_p1, %p512_p0 }
   0x9   :  { %520 = shalt.err (!%p517_p2)
}
   0xa   :  { %s521_s20 = scalar_lea.vmem %s17_s10, 128  ;;  %p526_p4 = scmp.lt.s32.totalorder %s17_s10, %s17_s10 }
   0xb   :  { %p522_p3 = scmp.ne.s32.totalorder %s17_s10, %s521_s20  ;;  %p527_p5 = scmp.lt.s32.totalorder %s521_s20, %s521_s20 }
   0xd   :  { %p528_p6 = por %p527_p5, %p526_p4 }
   0xf   :  { %p529_p7 = pnand %p528_p6, %p522_p3 }
  0x11   :  { %532 = shalt.err (!%p529_p7)
}
  0x12   :  { %19 = dma.hbm_to_vmem [thread:$0]  %s673_s0, 128, %s17_s10, [#allocation3]  }
  0x13   :  { %s533_s25 = scalar_lea.hbm %s674_s1, 4608 }
  0x14   :  { %p534_p8 = scmp.ne.s32.totalorder %s674_s1, %s533_s25  ;;  %p537_p9 = scmp.lt.u32.totalorder %s533_s25, %s674_s1 }
  0x16   :  { %p539_p10 = pnand %p537_p9, %p534_p8 }
  0x18   :  { %542 = shalt.err (!%p539_p10)
}
  0x19   :  { %s543_s30 = scalar_lea.vmem %s606_s12, 4608  ;;  %p548_p12 = scmp.lt.s32.totalorder %s606_s12, %s606_s12 }
  0x1a   :  { %p544_p11 = scmp.ne.s32.totalorder %s606_s12, %s543_s30  ;;  %p549_p13 = scmp.lt.s32.totalorder %s543_s30, %s543_s30 }
  0x1c   :  { %p550_p0 = por %p549_p13, %p548_p12 }
  0x1e   :  { %p551_p1 = pnand %p550_p0, %p544_p11 }
  0x20   :  { %554 = shalt.err (!%p551_p1)
}
  0x21   :  { %s585_s0 = smov 128   ;;  %s586_s3 = smov 8  }
  0x22   :  { %31 = dma.hbm_to_vmem [thread:$0]  %s674_s1, 4608, %s606_s12, [#allocation6], %s585_s0, %s585_s0, %s586_s3  }
  0x23   :  { %577 = dma.done.wait [#allocation3], 128  }
  0x24   :  { %578 = vsyncadd [#allocation3], 4294967168 }
  0x25   :  { %579 = dma.done.wait [#allocation6], 4608  }
  0x26   :  { %580 = vsyncadd [#allocation6], 4294962688  ;;  %v587_v0 = vmov 0.0|0.0   ;;  %vm588_vm0 = vmmov 0   ;;  %v589_v1 = vmov 0.0   ;;  %v39_v2 = vld [vmem:[#allocation5] sm:$0xff]  ;;  %v75_v52 = vlaneseq }
  0x27   :  { %450 = vmatprep.subr.bf16.mxu0 %v587_v0  ;;  %377 = vmatprep.mubr.msk.f32.mxu0 %vm588_vm0, %v589_v1  ;;  %v40_v3 = vld [vmem:[#allocation5 + $0x8] sm:$0xff]  ;;  %v42_v5 = vld [vmem:[#allocation5 + $0x18] sm:$0xff]  ;;  %v43_v6 = vld [vmem:[#allocation5 + $0x20] sm:$0xff]  ;;  %vm79_vm1 = vcmask 195584   ;;  %s590_s1 = smov [#allocation7]   ;;  %vm314_vm3 = vcmask 64512  }
  0x28   :  { %453 = vmatprep.subr.bf16.mxu1 %v587_v0  ;;  %412 = vmatprep.mubr.msk.f32.mxu1 %vm588_vm0, %v589_v1  ;;  %v451_v4 = vpack.c.bf16 %v40_v3, %v39_v2  ;;  %v44_v7 = vld [vmem:[#allocation5 + $0x28] sm:$0xff]  ;;  %v45_v8 = vld [vmem:[#allocation5 + $0x30] sm:$0xff]  ;;  %v454_v9 = vpack.c.bf16 %v43_v6, %v42_v5  ;;  %v641_v11 = vld [vmem:[#allocation2] sm:$0xff]  ;;  %v76_v53 = vshrl.u32 %v75_v52, 7  ;;  %s322_s6 = sshll.u32 %s590_s1, 4  ;;  %s323_s6 = int_to_ptr.vmem [resolvable:$true] %s322_s6 }
  0x29   :  { %v41_v10 = vld [vmem:[#allocation5 + $0x10] sm:$0xff]  ;;  %v457_v12 = vpack.c.bf16 %v45_v8, %v44_v7  ;;  %v46_v13 = vld [vmem:[#allocation5 + $0x38] sm:$0xff]  ;;  %v47_v14 = vld [vmem:[#allocation5 + $0x40] sm:$0xff]  ;;  %s555_s7 = scalar_lea.vmem %s323_s6, 128  ;;  %p560_p3 = scmp.lt.s32.totalorder %s323_s6, %s323_s6 }
  0x2a   :  { %452 = vmatpush3.bf16.msra.mxu0 %v451_v4  ;;  %455 = vmatpush3.bf16.msra.mxu1 %v454_v9  ;;  %v460_v15 = vpack.c.bf16 %v47_v14, %v46_v13  ;;  %v48_v16 = vld [vmem:[#allocation5 + $0x48] sm:$0xff]  ;;  %v49_v17 = vld [vmem:[#allocation5 + $0x50] sm:$0xff]  ;;  %v50_v19 = vld [vmem:[#allocation5 + $0x58] sm:$0xff]  ;;  %v77_v54 = vsub.s32 0, %v76_v53  ;;  %v231_v6 = vsub.s32 2, %v76_v53  ;;  %v311_v14 = vand.u32 127, %v75_v52  ;;  %p556_p2 = scmp.ne.s32.totalorder %s323_s6, %s555_s7  ;;  %p561_p4 = scmp.lt.s32.totalorder %s555_s7, %s555_s7 }
  0x2b   :  { %375 = vmatprep.subr.mxu0 %v589_v1  ;;  %456 = vmatprep.subr.bf16.mxu1 %v587_v0  ;;  %v463_v18 = vpack.c.bf16 %v49_v17, %v48_v16  ;;  %v51_v20 = vld [vmem:[#allocation5 + $0x60] sm:$0xff]  ;;  %v52_v22 = vld [vmem:[#allocation5 + $0x68] sm:$0xff]  ;;  %v53_v23 = vld [vmem:[#allocation5 + $0x70] sm:$0xff] }
  0x2c   :  { %v466_v21 = vpack.c.bf16 %v51_v20, %v50_v19  ;;  %v469_v24 = vpack.c.bf16 %v53_v23, %v52_v22  ;;  %v54_v25 = vld [vmem:[#allocation5 + $0x78] sm:$0xff]  ;;  %v55_v26 = vld [vmem:[#allocation5 + $0x80] sm:$0xff]  ;;  %v56_v28 = vld [vmem:[#allocation5 + $0x88] sm:$0xff]  ;;  %vm312_vm2 = vcmp.lt.s32.totalorder %v311_v14, 4  ;;  %p562_p5 = por %p561_p4, %p560_p3 }
  0x2d   :  { %v472_v27 = vpack.c.bf16 %v55_v26, %v54_v25  ;;  %v57_v29 = vld [vmem:[#allocation5 + $0x90] sm:$0xff]  ;;  %v58_v31 = vld [vmem:[#allocation5 + $0x98] sm:$0xff]  ;;  %v59_v32 = vld [vmem:[#allocation5 + $0xa0] sm:$0xff] }
  0x2e   :  { %376 = vmatpush3.msra.mxu0 %v41_v10  ;;  %458 = vmatpush3.bf16.msra.mxu1 %v457_v12  ;;  %v475_v30 = vpack.c.bf16 %v57_v29, %v56_v28  ;;  %v60_v33 = vld [vmem:[#allocation5 + $0xa8] sm:$0xff]  ;;  %v478_v34 = vpack.c.bf16 %v59_v32, %v58_v31  ;;  %v61_v35 = vld [vmem:[#allocation5 + $0xb0] sm:$0xff]  ;;  %v62_v37 = vld [vmem:[#allocation5 + $0xb8] sm:$0xff]  ;;  %v306_v12 = vsub.s32 3, %v76_v53  ;;  %p563_p6 = pnand %p562_p5, %p556_p2 }
  0x2f   :  { %378 = vmatmul.mubr.msk.f32.vlgmr.msra.gmra.mrb[0].mxu0 %vm79_vm1, %v641_v11  ;;  %477 = vmatprep.subr.bf16.mxu0 %v587_v0  ;;  %v481_v36 = vpack.c.bf16 %v61_v35, %v60_v33  ;;  %v63_v38 = vld [vmem:[#allocation5 + $0xc0] sm:$0xff]  ;;  %v64_v40 = vld [vmem:[#allocation5 + $0xc8] sm:$0xff]  ;;  %v65_v41 = vld [vmem:[#allocation5 + $0xd0] sm:$0xff] }
  0x30   :  { %447 = vmatprep.mubr.msk.f32.mxu0 %vm588_vm0, %v589_v1  ;;  %459 = vmatprep.subr.bf16.mxu1 %v587_v0  ;;  %v484_v39 = vpack.c.bf16 %v63_v38, %v62_v37  ;;  %v487_v42 = vpack.c.bf16 %v65_v41, %v64_v40  ;;  %v66_v43 = vld [vmem:[#allocation5 + $0xd8] sm:$0xff]  ;;  %v67_v44 = vld [vmem:[#allocation5 + $0xe0] sm:$0xff]  ;;  %v68_v46 = vld [vmem:[#allocation5 + $0xe8] sm:$0xff]  ;;  %v156_v1 = vsub.s32 1, %v76_v53 }
  0x31   :  { %479 = vmatpush3.bf16.msra.mxu0 %v478_v34  ;;  %v490_v45 = vpack.c.bf16 %v67_v44, %v66_v43  ;;  %v69_v47 = vld [vmem:[#allocation5 + $0xf0] sm:$0xff]  ;;  %v70_v49 = vld [vmem:[#allocation5 + $0xf8] sm:$0xff]  ;;  %v71_v50 = vld [vmem:[#allocation5 + $0x100] sm:$0xff] }
  0x32   :  { %461 = vmatpush3.bf16.msra.mxu1 %v460_v15  ;;  %480 = vmatprep.subr.bf16.mxu0 %v587_v0  ;;  %v493_v48 = vpack.c.bf16 %v69_v47, %v68_v46  ;;  %v496_v51 = vpack.c.bf16 %v71_v50, %v70_v49  ;;  %v74_v55 = vld [vmem:[#allocation5 + $0x118] sm:$0xff]  ;;  %v72_v61 = vld [vmem:[#allocation5 + $0x108] sm:$0xff]  ;;  %v73_v62 = vld [vmem:[#allocation5 + $0x110] sm:$0xff] }
  0x33   :  { %462 = vmatprep.subr.bf16.mxu1 %v587_v0  ;;  %v78_v56 = vrot.slane %v74_v55, %v77_v54  ;;  %v499_v63 = vpack.c.bf16 %v73_v62, %v72_v61  ;;  %v157_v2 = vrot.slane %v74_v55, %v156_v1  ;;  %v232_v7 = vrot.slane %v74_v55, %v231_v6 }
  0x34   :  { %v307_v13 = vrot.slane %v74_v55, %v306_v12 }
  0x35   :  { %482 = vmatpush3.bf16.msra.mxu0 %v481_v36 }
  0x36   :  { %464 = vmatpush3.bf16.msra.mxu1 %v463_v18  ;;  %483 = vmatprep.subr.bf16.mxu0 %v587_v0  ;;  %v308_v15 = vmul.f32 %v307_v13, %v641_v11 }
  0x37   :  { %465 = vmatprep.subr.bf16.mxu1 %v587_v0 }
  0x39   :  { %485 = vmatpush3.bf16.msra.mxu0 %v484_v39 }
  0x3a   :  { %467 = vmatpush3.bf16.msra.mxu1 %v466_v21  ;;  %486 = vmatprep.subr.bf16.mxu0 %v587_v0 }
  0x3b   :  { %468 = vmatprep.subr.bf16.mxu1 %v587_v0 }
  0x3d   :  { %488 = vmatpush3.bf16.msra.mxu0 %v487_v42 }
  0x3e   :  { %470 = vmatpush3.bf16.msra.mxu1 %v469_v24  ;;  %489 = vmatprep.subr.bf16.mxu0 %v587_v0 }
  0x3f   :  { %471 = vmatprep.subr.bf16.mxu1 %v587_v0 }
  0x41   :  { %491 = vmatpush3.bf16.msra.mxu0 %v490_v45 }
  0x42   :  { %473 = vmatpush3.bf16.msra.mxu1 %v472_v27  ;;  %492 = vmatprep.subr.bf16.mxu0 %v587_v0 }
  0x43   :  { %474 = vmatprep.subr.bf16.mxu1 %v587_v0 }
  0x45   :  { %494 = vmatpush3.bf16.msra.mxu0 %v493_v48 }
  0x46   :  { %476 = vmatpush3.bf16.msra.mxu1 %v475_v30  ;;  %495 = vmatprep.subr.bf16.mxu0 %v587_v0 }
  0x49   :  { %497 = vmatpush3.bf16.msra.mxu0 %v496_v51 }
  0x4a   :  { %498 = vmatprep.subr.bf16.mxu0 %v587_v0 }
  0x4d   :  { %500 = vmatpush3.bf16.msra.mxu0 %v499_v63 }
 0x102   :  { %v149_v57 = vpop.f32.mrb[0].mxu0 }
 0x103   :  { %v150_v58 = vadd.f32 %v149_v57, %v78_v56  ;;  %v379_v59 = vpop.f32.mrb[1].mxu0 }
 0x105   :  { %v153_v60 = vmax.f32 %v150_v58, 0.0 }
 0x107   :  { %413 = vmatmul.mubr.f32.vlgmr.msra.gmra.mrb[0].mxu1 %v153_v60 }
 0x1da   :  { %v224_v3 = vpop.f32.mrb[0].mxu1 }
 0x1db   :  { %v225_v4 = vadd.f32 %v224_v3, %v157_v2  ;;  %v414_v5 = vpop.f32.mrb[1].mxu1 }
 0x1dd   :  { %v228_v0 = vmax.f32 %v225_v4, 0.0 }
 0x1df   :  { %448 = vmatmul.mubr.f32.vlgmr.msra.gmra.mrb[2].mxu0 %v228_v0 }
 0x2b2   :  { %v299_v8 = vpop.f32.mrb[2].mxu0 }
 0x2b3   :  { %v300_v9 = vadd.f32 %v299_v8, %v232_v7  ;;  %v449_v10 = vpop.f32.mrb[3].mxu0 }
 0x2b5   :  { %509 = vtanh.f32 %v300_v9 }
 0x2bf   :  { %v510_v16 = vpop.eup %509 }
 0x2c0   :  { %v309_v17 = vadd.f32 %v510_v16, %v308_v15 }
 0x2c2   :  { %v313_v18 = vsel %vm312_vm2, %v309_v17, %v300_v9 }
 0x2c3   :  { %315 = vst.msk [vmem:[#allocation7] sm:$0xff] %vm314_vm3, %v313_v18 }
 0x2c4   :  { %566 = shalt.err (!%p563_p6)
}
 0x2c5   :  { %s567_s10 = scalar_lea.hbm %s675_s2, 128 }
 0x2c6   :  { %p568_p7 = scmp.ne.s32.totalorder %s675_s2, %s567_s10  ;;  %p571_p8 = scmp.lt.u32.totalorder %s567_s10, %s675_s2 }
 0x2c8   :  { %p573_p9 = pnand %p571_p8, %p568_p7 }
 0x2ca   :  { %576 = shalt.err (!%p573_p9)
}
 0x2cb   :  { %325 = dma.vmem_to_hbm [thread:$0]  %s323_s6, 128, %s675_s2, [#allocation4]  }
 0x2cc   :  { %581 = dma.done.wait [#allocation4], 128  }
 0x2cd   :  { %582 = vsyncadd [#allocation4], 4294967168 }
 0x2ce   :  { %329 = vsyncpa [#allocation3], 1 }
 0x2cf   :  { %330 = vsyncpa [#allocation6], 1 }
 0x2d0   :  { %331 = vsyncpa [#allocation4], 1 }

</bundles_post_ra>
